<compile_context>
chip_gen: v5e
topology: v5e:2x2
jax: 0.10.0
libtpu: 0.0.40
codegen_flags: <defaults>
</compile_context>

<pallas_src>
import functools

import jax
import jax.numpy as jnp
from jax.experimental import pallas as pl
from jax.experimental.pallas import tpu as pltpu


def _round_up(n, m):
    return ((n + m - 1) // m) * m


def _interaction_kernel(x_ref, y_ref, w_ref, wx_ref, wy_ref, b_ref, o_ref, *,
                        n_blk, bx, by, output_dim):
    """One row-tile of the forward pass.

    x_ref  : (tm, x_dim)              matmul dtype
    y_ref  : (tm, y_dim_k)            matmul dtype (lane-padded in fused path)
    w_ref  : (n_blk, bx, O*by)        bilinear weight blocks
    wx_ref : (x_dim, O)               w_x.weight^T
    wy_ref : (y_dim_k, O)             w_y.weight^T (zero rows in lane padding)
    b_ref  : (1, O)                   w_x.bias + w_y.bias   (fp32)
    o_ref  : (tm, O)
    """
    x = x_ref[...]
    y = y_ref[...]
    tm = x.shape[0]
    O = output_dim

    # Linear terms: two tiny MXU matmuls (fp32 accumulation) + bias.
    acc = (jnp.dot(x, wx_ref[...], preferred_element_type=jnp.float32)
           + jnp.dot(y, wy_ref[...], preferred_element_type=jnp.float32)
           + b_ref[...])

    y_f = y.astype(jnp.float32)
    for h in range(n_blk):                      # static (unrolled) head loop
        x_h = x[:, h * bx:(h + 1) * bx]         # lane aligned (bx % 128 == 0 or full)
        z_h = jnp.dot(x_h, w_ref[h], preferred_element_type=jnp.float32)  # (tm, O*by)
        y_h = y_f[:, h * by:(h + 1) * by]
        if O == 1:
            acc = acc + jnp.sum(z_h * y_h, axis=-1, keepdims=True)
        else:
            # Lane-aligned reshape (by % 128 == 0) -> one reduce, no per-o slices.
            acc = acc + jnp.sum(z_h.reshape(tm, O, by) * y_h[:, None, :], axis=-1)

    o_ref[...] = acc.astype(o_ref.dtype)        # single lane-dense full-tile store


def _vmem_capacity_bytes():
    try:
        info = pltpu.get_tpu_info()
        for attr in ("vmem_capacity_bytes", "vmem_size_bytes", "vmem_bytes"):
            v = getattr(info, attr, None)
            if v:
                return int(v)
    except Exception:
        pass
    return 64 * 1024 * 1024        # conservative default (v7x per-core VMEM)


def interaction_aggregation(x, y, params, *, num_heads, output_dim,
                            block_rows=1024, mxu_dtype=None):
    B, I, x_dim = x.shape
    y_dim = y.shape[-1]
    assert x_dim % num_heads == 0 and y_dim % num_heads == 0
    dx = x_dim // num_heads
    dy = y_dim // num_heads
    N = B * I
    O = output_dim
    out_dtype = x.dtype
    m_dtype = jnp.dtype(mxu_dtype) if mxu_dtype is not None else jnp.dtype(x.dtype)

    # Effective bilinear weight with exact PyTorch view() semantics:
    #   W_eff[h, i, o, j] couples head-h x index i, output o, head-h y index j.
    w4 = params["w_xy"].reshape(num_heads, dx, O, dy)

    # Path selection: per-head matmuls when heads are large & lane aligned
    # (avoids (H-1)/H zero MXU pushes), otherwise a single fused block-diagonal
    # matmul with each output's column block lane-padded to a multiple of 128.
    per_head = num_heads >= 4 and dx % 128 == 0 and dy % 128 == 0
    if per_head:
        n_blk, bx, by = num_heads, dx, dy
        y_dim_k = y_dim
        w_blk = w4.reshape(num_heads, dx, O * dy)
    else:
        n_blk, bx = 1, x_dim
        by = _round_up(y_dim, 128)
        y_dim_k = by
        w3 = jnp.zeros((x_dim, O, by), dtype=w4.dtype)
        for h in range(num_heads):               # O(true-weight-size) scatter
            w3 = w3.at[h * dx:(h + 1) * dx, :, h * dy:(h + 1) * dy].set(w4[h])
        w_blk = w3.reshape(1, x_dim, O * by)

    wx_t = params["w_x_weight"].T                                    # (x_dim, O)
    wy_t = params["w_y_weight"].T                                    # (y_dim, O)
    if y_dim_k != y_dim:
        wy_t = jnp.pad(wy_t, ((0, y_dim_k - y_dim), (0, 0)))
    bias = (params["w_x_bias"] + params["w_y_bias"]).reshape(1, O).astype(jnp.float32)

    w_blk = w_blk.astype(m_dtype)
    wx_t = wx_t.astype(m_dtype)
    wy_t = wy_t.astype(m_dtype)

    # ---- Row tiling derived from the actual VMEM footprint ------------------
    in_item = jnp.dtype(m_dtype).itemsize
    out_item = jnp.dtype(out_dtype).itemsize
    row_align = max(8, 32 // in_item)            # sublane tile: 8 f32 / 16 bf16
    weight_bytes = (w_blk.size + wx_t.size + wy_t.size) * in_item + bias.size * 4
    per_row = (2 * x_dim * in_item               # x tile, double buffered
               + 2 * y_dim_k * in_item           # y tile, double buffered
               + 2 * O * out_item                # out tile, double buffered
               + y_dim_k * 4                     # y_f fp32
               + 2 * O * by * 4                  # z_h + product intermediate
               + 4 * O * 4)                      # lin / acc columns
    vmem_cap = _vmem_capacity_bytes()
    budget = max(vmem_cap // 2 - weight_bytes, 4 * 1024 * 1024)
    br = max(row_align, min(budget // per_row, block_rows))
    # Ensure >= 2 grid steps when there is enough work (both v7x TensorCores).
    br = min(br, _round_up(max(pl.cdiv(N, 2), 1), row_align))
    br = max(row_align, (br // row_align) * row_align)
    n_pad = _round_up(N, br)

    x2 = x.reshape(N, x_dim).astype(m_dtype)
    y2 = y.reshape(N, y_dim).astype(m_dtype)
    if n_pad != N:
        x2 = jnp.pad(x2, ((0, n_pad - N), (0, 0)))
        y2 = jnp.pad(y2, ((0, n_pad - N), (0, 0)))
    if y_dim_k != y_dim:
        y2 = jnp.pad(y2, ((0, 0), (0, y_dim_k - y_dim)))

    vmem_limit = int(weight_bytes + br * per_row + 16 * 1024 * 1024)
    vmem_limit = max(32 * 1024 * 1024, min(vmem_limit, vmem_cap))

    kernel = functools.partial(_interaction_kernel, n_blk=n_blk, bx=bx, by=by,
                               output_dim=O)

    def _call(single_buffer_weights):
        wmode = ({"pipeline_mode": pl.Buffered(1)} if single_buffer_weights else {})
        grid_spec = pltpu.PrefetchScalarGridSpec(
            num_scalar_prefetch=0,
            grid=(n_pad // br,),
            in_specs=[
                pl.BlockSpec((br, x_dim), lambda i: (i, 0)),
                pl.BlockSpec((br, y_dim_k), lambda i: (i, 0)),
                pl.BlockSpec((n_blk, bx, O * by), lambda i: (0, 0, 0), **wmode),
                pl.BlockSpec((x_dim, O), lambda i: (0, 0), **wmode),
                pl.BlockSpec((y_dim_k, O), lambda i: (0, 0), **wmode),
                pl.BlockSpec((1, O), lambda i: (0, 0), **wmode),
            ],
            out_specs=pl.BlockSpec((br, O), lambda i: (i, 0)),
        )
        return pl.pallas_call(
            kernel,
            out_shape=jax.ShapeDtypeStruct((n_pad, O), out_dtype),
            grid_spec=grid_spec,
            compiler_params=pltpu.CompilerParams(
                dimension_semantics=("parallel",),
                vmem_limit_bytes=vmem_limit),
        )(x2, y2, w_blk, wx_t, wy_t, bias)

    try:
        out2 = _call(True)
    except Exception:
        # TODO(synk): pl.Buffered(1) single-buffering unsupported on this jax
        # build; fall back to default double-buffered constant weight blocks.
        out2 = _call(False)

    out = out2[:N].reshape(B, I, O)
    if O == 1:                       # torch .squeeze(-1) drops only a size-1 dim
        out = out[..., 0]
    return out


# ------------------------------- reference ---------------------------------
def _reference(x, y, params, *, num_heads, output_dim):
    """Pure-JAX transcription of the PyTorch forward (incl. view semantics)."""
    B, I, x_dim = x.shape
    y_dim = y.shape[-1]
    dx = x_dim // num_heads
    dy = y_dim // num_heads
    hp = jax.lax.Precision.HIGHEST
    out = (jnp.einsum("bik,ok->bio", x, params["w_x_weight"], precision=hp)
           + params["w_x_bias"]
           + jnp.einsum("bik,ok->bio", y, params["w_y_weight"], precision=hp)
           + params["w_y_bias"])
    head_x = x.reshape(B * I, num_heads, dx)
    head_y = y.reshape(B * I, num_heads, dy)
    w1 = params["w_xy"].reshape(num_heads, dx, dy * output_dim)
    t = jnp.einsum("nhi,hik->nhk", head_x, w1, precision=hp)
    t2 = t.reshape(B * I, num_heads, output_dim, dy)
    xy = jnp.einsum("nhoj,nhj->nho", t2, head_y, precision=hp)
    xy = xy.sum(axis=1).reshape(B, I, output_dim)
    out = out + xy
    if output_dim == 1:
        out = out[..., 0]
    return out


def _make_params(key, x_dim, y_dim, num_heads, output_dim):
    k = jax.random.split(key, 5)
    dx, dy = x_dim // num_heads, y_dim // num_heads
    return {
        "w_x_weight": jax.random.normal(k[0], (output_dim, x_dim), jnp.float32) * 0.1,
        "w_x_bias":   jax.random.normal(k[1], (output_dim,), jnp.float32) * 0.1,
        "w_y_weight": jax.random.normal(k[2], (output_dim, y_dim), jnp.float32) * 0.1,
        "w_y_bias":   jax.random.normal(k[3], (output_dim,), jnp.float32) * 0.1,
        # xavier_normal_ std = sqrt(2 / (fan_in + fan_out))
        "w_xy": jax.random.normal(k[4], (num_heads * dx * dy, output_dim), jnp.float32)
                * jnp.sqrt(2.0 / (num_heads * dx * dy + output_dim)),
    }


def _run_case(key, *, B, I, x_dim, y_dim, num_heads, output_dim,
              block_rows=1024, mxu_dtype=None, tol=2e-3):
    kx, ky, kp = jax.random.split(key, 3)
    x = jax.random.normal(kx, (B, I, x_dim), jnp.float32)
    y = jax.random.normal(ky, (B, I, y_dim), jnp.float32)
    params = _make_params(kp, x_dim, y_dim, num_heads, output_dim)
    out = interaction_aggregation(x, y, params, num_heads=num_heads,
                                  output_dim=output_dim, block_rows=block_rows,
                                  mxu_dtype=mxu_dtype)
    out = jax.block_until_ready(out)
    ref = _reference(x, y, params, num_heads=num_heads, output_dim=output_dim)
    assert out.shape == ref.shape, (out.shape, ref.shape)
    scale = float(jnp.max(jnp.abs(ref))) + 1.0
    err = float(jnp.max(jnp.abs(out.astype(jnp.float32) - ref)))
    assert err <= tol * scale, (err, tol * scale)


if __name__ == "__main__":
    key = jax.random.PRNGKey(0)
    k1, k2, k3, k4, k5 = jax.random.split(key, 5)
    # 1) Canonical FinalMLP setting (output_dim=1), fused path, multi-step grid.
    _run_case(k1, B=2, I=8, x_dim=32, y_dim=32, num_heads=2, output_dim=1)
    # 2) Ragged row count (padding path) + lane padding (y_dim=64 -> 128).
    _run_case(k2, B=4, I=33, x_dim=32, y_dim=64, num_heads=4, output_dim=1,
              block_rows=64)
    # 3) output_dim > 1: reshape epilogue + single full-tile store.
    _run_case(k3, B=2, I=8, x_dim=16, y_dim=16, num_heads=2, output_dim=2)
    # 4) Per-head matmul path (num_heads >= 4, head dims multiples of 128).
    _run_case(k4, B=2, I=4, x_dim=512, y_dim=512, num_heads=4, output_dim=1)
    # 5) bf16 MXU operands with fp32 accumulation (looser tolerance).
    _run_case(k5, B=2, I=8, x_dim=128, y_dim=128, num_heads=2, output_dim=1,
              mxu_dtype=jnp.bfloat16, tol=3e-2)
    print("KERNEL_OK")
</pallas_src>

<mosaic_0001>
module attributes {stable_mosaic.version = 11 : i64} {
  func.func @_interaction_kernel(%arg0: i32, %arg1: memref<8x32xf32, #tpu.memory_space<vmem>>, %arg2: memref<8x128xf32, #tpu.memory_space<vmem>>, %arg3: memref<1x32x128xf32, #tpu.memory_space<vmem>>, %arg4: memref<32x1xf32, #tpu.memory_space<vmem>>, %arg5: memref<128x1xf32, #tpu.memory_space<vmem>>, %arg6: memref<1x1xf32, #tpu.memory_space<vmem>>, %arg7: memref<8x1xf32, #tpu.memory_space<vmem>>) attributes {dimension_semantics = [#tpu.dimension_semantics<parallel>], iteration_bounds = array<i64: 2>, scalar_prefetch = 0 : i64, scratch_operands = 0 : i64, tpu.core_type = #tpu.core_type<tc>, window_params = [{transform_indices = @transform_0, window_bounds = array<i64: 8, 32>}, {transform_indices = @transform_1, window_bounds = array<i64: 8, 128>}, {pipeline_mode = #tpu.pipeline_mode<synchronous>, transform_indices = @transform_2, window_bounds = array<i64: 1, 32, 128>}, {pipeline_mode = #tpu.pipeline_mode<synchronous>, transform_indices = @transform_3, window_bounds = array<i64: 32, 1>}, {pipeline_mode = #tpu.pipeline_mode<synchronous>, transform_indices = @transform_4, window_bounds = array<i64: 128, 1>}, {pipeline_mode = #tpu.pipeline_mode<synchronous>, transform_indices = @transform_5, window_bounds = array<i64: 1, 1>}, {transform_indices = @transform_6, window_bounds = array<i64: 8, 1>}]} {
    %c0 = arith.constant 0 : index
    %c0_0 = arith.constant 0 : index
    %0 = vector.load %arg1[%c0, %c0_0] : memref<8x32xf32, #tpu.memory_space<vmem>>, vector<8x32xf32>
    %c0_1 = arith.constant 0 : index
    %c0_2 = arith.constant 0 : index
    %1 = vector.load %arg2[%c0_1, %c0_2] : memref<8x128xf32, #tpu.memory_space<vmem>>, vector<8x128xf32>
    %c0_3 = arith.constant 0 : index
    %c0_4 = arith.constant 0 : index
    %2 = vector.load %arg4[%c0_3, %c0_4] : memref<32x1xf32, #tpu.memory_space<vmem>>, vector<32x1xf32>
    %cst = arith.constant dense<0.000000e+00> : vector<8x1xf32>
    %3 = tpu.matmul %0, %2, %cst {dimension_numbers = #tpu.dot_dimension_numbers<[1], [0], [0], [1], [0, 0, 1, 1], [], []>} : vector<8x32xf32>, vector<32x1xf32>, vector<8x1xf32> -> vector<8x1xf32>
    %c0_5 = arith.constant 0 : index
    %c0_6 = arith.constant 0 : index
    %4 = vector.load %arg5[%c0_5, %c0_6] : memref<128x1xf32, #tpu.memory_space<vmem>>, vector<128x1xf32>
    %cst_7 = arith.constant dense<0.000000e+00> : vector<8x1xf32>
    %5 = tpu.matmul %1, %4, %cst_7 {dimension_numbers = #tpu.dot_dimension_numbers<[1], [0], [0], [1], [0, 0, 1, 1], [], []>} : vector<8x128xf32>, vector<128x1xf32>, vector<8x1xf32> -> vector<8x1xf32>
    %6 = arith.addf %3, %5 : vector<8x1xf32>
    %c0_8 = arith.constant 0 : index
    %c0_9 = arith.constant 0 : index
    %7 = vector.load %arg6[%c0_8, %c0_9] : memref<1x1xf32, #tpu.memory_space<vmem>>, vector<1x1xf32>
    %8 = vector.broadcast %7 : vector<1x1xf32> to vector<8x1xf32>
    %9 = arith.addf %6, %8 : vector<8x1xf32>
    %c0_10 = arith.constant 0 : index
    %c0_11 = arith.constant 0 : index
    %c0_12 = arith.constant 0 : index
    %10 = vector.load %arg3[%c0_10, %c0_11, %c0_12] : memref<1x32x128xf32, #tpu.memory_space<vmem>>, vector<1x32x128xf32>
    %11 = vector.shape_cast %10 : vector<1x32x128xf32> to vector<32x128xf32>
    %cst_13 = arith.constant dense<0.000000e+00> : vector<8x128xf32>
    %12 = tpu.matmul %0, %11, %cst_13 {dimension_numbers = #tpu.dot_dimension_numbers<[1], [0], [0], [1], [0, 0, 1, 1], [], []>} : vector<8x32xf32>, vector<32x128xf32>, vector<8x128xf32> -> vector<8x128xf32>
    %13 = arith.mulf %12, %1 : vector<8x128xf32>
    %cst_14 = arith.constant dense<0.000000e+00> : vector<8xf32>
    %14 = vector.multi_reduction <add>, %13, %cst_14 [1] : vector<8x128xf32> to vector<8xf32>
    %15 = vector.shape_cast %14 : vector<8xf32> to vector<8x1xf32>
    %16 = arith.addf %9, %15 : vector<8x1xf32>
    %c0_15 = arith.constant 0 : index
    %c0_16 = arith.constant 0 : index
    %17 = vector.load %arg7[%c0_15, %c0_16] : memref<8x1xf32, #tpu.memory_space<vmem>>, vector<8x1xf32>
    tpu.vector_store %arg7[%c0_15, %c0_16], %16 {strides = array<i32>} : memref<8x1xf32, #tpu.memory_space<vmem>>, vector<8x1xf32>,
    return
  }
  func.func @transform_0(%arg0: i32) -> (i32, i32) {
    %c0_i32 = arith.constant 0 : i32
    %c0_i32_0 = arith.constant 0 : i32
    return %arg0, %c0_i32 : i32, i32
  }
  func.func @transform_1(%arg0: i32) -> (i32, i32) {
    %c0_i32 = arith.constant 0 : i32
    %c0_i32_0 = arith.constant 0 : i32
    return %arg0, %c0_i32 : i32, i32
  }
  func.func @transform_2(%arg0: i32) -> (i32, i32, i32) {
    %c0_i32 = arith.constant 0 : i32
    %c0_i32_0 = arith.constant 0 : i32
    %c0_i32_1 = arith.constant 0 : i32
    %c0_i32_2 = arith.constant 0 : i32
    return %c0_i32, %c0_i32_0, %c0_i32_1 : i32, i32, i32
  }
  func.func @transform_3(%arg0: i32) -> (i32, i32) {
    %c0_i32 = arith.constant 0 : i32
    %c0_i32_0 = arith.constant 0 : i32
    %c0_i32_1 = arith.constant 0 : i32
    return %c0_i32, %c0_i32_0 : i32, i32
  }
  func.func @transform_4(%arg0: i32) -> (i32, i32) {
    %c0_i32 = arith.constant 0 : i32
    %c0_i32_0 = arith.constant 0 : i32
    %c0_i32_1 = arith.constant 0 : i32
    return %c0_i32, %c0_i32_0 : i32, i32
  }
  func.func @transform_5(%arg0: i32) -> (i32, i32) {
    %c0_i32 = arith.constant 0 : i32
    %c0_i32_0 = arith.constant 0 : i32
    %c0_i32_1 = arith.constant 0 : i32
    return %c0_i32, %c0_i32_0 : i32, i32
  }
  func.func @transform_6(%arg0: i32) -> (i32, i32) {
    %c0_i32 = arith.constant 0 : i32
    %c0_i32_0 = arith.constant 0 : i32
    return %arg0, %c0_i32 : i32, i32
  }
}

module attributes {stable_mosaic.version = 11 : i64} {
  func.func @_interaction_kernel(%arg0: i32, %arg1: memref<8x32xf32, #tpu.memory_space<vmem>>, %arg2: memref<8x128xf32, #tpu.memory_space<vmem>>, %arg3: memref<1x32x128xf32, #tpu.memory_space<vmem>>, %arg4: memref<32x1xf32, #tpu.memory_space<vmem>>, %arg5: memref<128x1xf32, #tpu.memory_space<vmem>>, %arg6: memref<1x1xf32, #tpu.memory_space<vmem>>, %arg7: memref<8x1xf32, #tpu.memory_space<vmem>>) attributes {dimension_semantics = [#tpu.dimension_semantics<parallel>], iteration_bounds = array<i64: 2>, scalar_prefetch = 0 : i64, scratch_operands = 0 : i64, tpu.core_type = #tpu.core_type<tc>, window_params = [{transform_indices = @transform_0, window_bounds = array<i64: 8, 32>}, {transform_indices = @transform_1, window_bounds = array<i64: 8, 128>}, {pipeline_mode = #tpu.pipeline_mode<synchronous>, transform_indices = @transform_2, window_bounds = array<i64: 1, 32, 128>}, {pipeline_mode = #tpu.pipeline_mode<synchronous>, transform_indices = @transform_3, window_bounds = array<i64: 32, 1>}, {pipeline_mode = #tpu.pipeline_mode<synchronous>, transform_indices = @transform_4, window_bounds = array<i64: 128, 1>}, {pipeline_mode = #tpu.pipeline_mode<synchronous>, transform_indices = @transform_5, window_bounds = array<i64: 1, 1>}, {transform_indices = @transform_6, window_bounds = array<i64: 8, 1>}]} {
    %c0 = arith.constant 0 : index
    %c0_0 = arith.constant 0 : index
    %0 = vector.load %arg1[%c0, %c0_0] : memref<8x32xf32, #tpu.memory_space<vmem>>, vector<8x32xf32>
    %c0_1 = arith.constant 0 : index
    %c0_2 = arith.constant 0 : index
    %1 = vector.load %arg2[%c0_1, %c0_2] : memref<8x128xf32, #tpu.memory_space<vmem>>, vector<8x128xf32>
    %c0_3 = arith.constant 0 : index
    %c0_4 = arith.constant 0 : index
    %2 = vector.load %arg4[%c0_3, %c0_4] : memref<32x1xf32, #tpu.memory_space<vmem>>, vector<32x1xf32>
    %cst = arith.constant dense<0.000000e+00> : vector<8x1xf32>
    %3 = tpu.matmul %0, %2, %cst {dimension_numbers = #tpu.dot_dimension_numbers<[1], [0], [0], [1], [0, 0, 1, 1], [], []>} : vector<8x32xf32>, vector<32x1xf32>, vector<8x1xf32> -> vector<8x1xf32>
    %c0_5 = arith.constant 0 : index
    %c0_6 = arith.constant 0 : index
    %4 = vector.load %arg5[%c0_5, %c0_6] : memref<128x1xf32, #tpu.memory_space<vmem>>, vector<128x1xf32>
    %cst_7 = arith.constant dense<0.000000e+00> : vector<8x1xf32>
    %5 = tpu.matmul %1, %4, %cst_7 {dimension_numbers = #tpu.dot_dimension_numbers<[1], [0], [0], [1], [0, 0, 1, 1], [], []>} : vector<8x128xf32>, vector<128x1xf32>, vector<8x1xf32> -> vector<8x1xf32>
    %6 = arith.addf %3, %5 : vector<8x1xf32>
    %c0_8 = arith.constant 0 : index
    %c0_9 = arith.constant 0 : index
    %7 = vector.load %arg6[%c0_8, %c0_9] : memref<1x1xf32, #tpu.memory_space<vmem>>, vector<1x1xf32>
    %8 = vector.broadcast %7 : vector<1x1xf32> to vector<8x1xf32>
    %9 = arith.addf %6, %8 : vector<8x1xf32>
    %c0_10 = arith.constant 0 : index
    %c0_11 = arith.constant 0 : index
    %c0_12 = arith.constant 0 : index
    %10 = vector.load %arg3[%c0_10, %c0_11, %c0_12] : memref<1x32x128xf32, #tpu.memory_space<vmem>>, vector<1x32x128xf32>
    %11 = vector.shape_cast %10 : vector<1x32x128xf32> to vector<32x128xf32>
    %cst_13 = arith.constant dense<0.000000e+00> : vector<8x128xf32>
    %12 = tpu.matmul %0, %11, %cst_13 {dimension_numbers = #tpu.dot_dimension_numbers<[1], [0], [0], [1], [0, 0, 1, 1], [], []>} : vector<8x32xf32>, vector<32x128xf32>, vector<8x128xf32> -> vector<8x128xf32>
    %13 = arith.mulf %12, %1 : vector<8x128xf32>
    %cst_14 = arith.constant dense<0.000000e+00> : vector<8xf32>
    %14 = vector.multi_reduction <add>, %13, %cst_14 [1] : vector<8x128xf32> to vector<8xf32>
    %15 = vector.shape_cast %14 : vector<8xf32> to vector<8x1xf32>
    %16 = arith.addf %9, %15 : vector<8x1xf32>
    %c0_15 = arith.constant 0 : index
    %c0_16 = arith.constant 0 : index
    %17 = vector.load %arg7[%c0_15, %c0_16] : memref<8x1xf32, #tpu.memory_space<vmem>>, vector<8x1xf32>
    tpu.vector_store %arg7[%c0_15, %c0_16], %16 {strides = array<i32>} : memref<8x1xf32, #tpu.memory_space<vmem>>, vector<8x1xf32>,
    return
  }
  func.func @transform_0(%arg0: i32) -> (i32, i32) {
    %c0_i32 = arith.constant 0 : i32
    %c0_i32_0 = arith.constant 0 : i32
    return %arg0, %c0_i32 : i32, i32
  }
  func.func @transform_1(%arg0: i32) -> (i32, i32) {
    %c0_i32 = arith.constant 0 : i32
    %c0_i32_0 = arith.constant 0 : i32
    return %arg0, %c0_i32 : i32, i32
  }
  func.func @transform_2(%arg0: i32) -> (i32, i32, i32) {
    %c0_i32 = arith.constant 0 : i32
    %c0_i32_0 = arith.constant 0 : i32
    %c0_i32_1 = arith.constant 0 : i32
    %c0_i32_2 = arith.constant 0 : i32
    return %c0_i32, %c0_i32_0, %c0_i32_1 : i32, i32, i32
  }
  func.func @transform_3(%arg0: i32) -> (i32, i32) {
    %c0_i32 = arith.constant 0 : i32
    %c0_i32_0 = arith.constant 0 : i32
    %c0_i32_1 = arith.constant 0 : i32
    return %c0_i32, %c0_i32_0 : i32, i32
  }
  func.func @transform_4(%arg0: i32) -> (i32, i32) {
    %c0_i32 = arith.constant 0 : i32
    %c0_i32_0 = arith.constant 0 : i32
    %c0_i32_1 = arith.constant 0 : i32
    return %c0_i32, %c0_i32_0 : i32, i32
  }
  func.func @transform_5(%arg0: i32) -> (i32, i32) {
    %c0_i32 = arith.constant 0 : i32
    %c0_i32_0 = arith.constant 0 : i32
    %c0_i32_1 = arith.constant 0 : i32
    return %c0_i32, %c0_i32_0 : i32, i32
  }
  func.func @transform_6(%arg0: i32) -> (i32, i32) {
    %c0_i32 = arith.constant 0 : i32
    %c0_i32_0 = arith.constant 0 : i32
    return %arg0, %c0_i32 : i32, i32
  }
}

</mosaic_0001>

<bundles_post_ra>
// kernel: tpu_custom_call.1
= control target key start
LH: loop header
LB: loop body
LE: loop exit
PB: predicated region body
PF: predicated region fallthrough
CT: control target
= control target key end

     0   :  { %s499_s23 = smov 0   ;;  %s598_s0 = inlined_call_operand.vmem [shape: f32[16,32], index: 0, kind: input, shape index: {}]   ;;  %s599_s1 = inlined_call_operand.vmem [shape: f32[16,128], index: 1, kind: input, shape index: {}]   ;;  %s600_s2 = inlined_call_operand.vmem [shape: f32[1,32,128], index: 2, kind: input, shape index: {}]   ;;  %s601_s3 = inlined_call_operand.vmem [shape: f32[32,1], index: 3, kind: input, shape index: {}]   ;;  %s602_s4 = inlined_call_operand.vmem [shape: f32[128,1], index: 4, kind: input, shape index: {}]   ;;  %s603_s5 = inlined_call_operand.<no memory space> [shape: f32[1,1], index: 5, kind: input, shape index: {}]   ;;  %s604_s6 = inlined_call_operand.vmem [shape: f32[16,1], index: 6, kind: output, shape index: {}]  }
   0x1   :  { %v11_v0 = vstv %s603_s5 }
   0x2   :  { %12 = vst [vmem:[#allocation2] sm:$0x1] %v11_v0 }
   0x3 LB: > { %s432_s24 = sadd.s32 4294967295, %s459_s23   ;;  %p436_p0 = scmp.ge.s32.totalorder %s459_s23, 1  ;;  %s459_s23 = sphi %s499_s23, %s18_s23  }
   0x4   : > { %p222_p1 = scmp.lt.s32.totalorder %s459_s23, 3 }
   0x6   : > { %p223_p2 = pnand %p436_p0, %p222_p1 }
   0x7   : > { %p254_p3 = scmp.lt.s32.totalorder (!%p223_p2), %s432_s24, 1 }
   0x8   : > { %226 = sbr.rel (%p223_p2) target bundleno = 274 (0x112), region = 44 }
   0xd   : > { %v340_v1 = vld [vmem:[%s600_s2 + $0x18] sm:$0xff]  ;;  %v339_v2 = vld [vmem:[%s600_s2 + $0x10] sm:$0xff]  ;;  %v338_v5 = vld [vmem:[%s600_s2 + $0x8] sm:$0xff]  ;;  %s606_s24 = smov (!%p254_p3, %s432_s24), 1  ;;  %vm308_vm0 = vcmask 261120   ;;  %vm365_vm1 = vcmask 7168  }
   0xe   : > { %353 = vmatpush.msra.mxu2 %v340_v1  ;;  %v287_v3 = vld [vmem:[%s602_s4 + $0x78] sm:$0xff]  ;;  %v286_v4 = vld [vmem:[%s602_s4 + $0x70] sm:$0xff]  ;;  %v285_v6 = vld [vmem:[%s602_s4 + $0x68] sm:$0xff]  ;;  %s528_s14 = sshll.u32 %s606_s24, 3 }
   0xf   : > { %288 = vmatpush.msra.mxu0 %v287_v3  ;;  %v337_v7 = vld [vmem:[%s600_s2] sm:$0xff]  ;;  %s257_s17 = scalar_lea.vmem %s598_s0, %s528_s14  ;;  %v271_v9 = vld [vmem:[%s601_s3 + $0x18] sm:$0xff]  ;;  %v270_v11 = vld [vmem:[%s601_s3 + $0x10] sm:$0xff]  ;;  %s261_s29 = scalar_lea.vmem %s599_s1, %s528_s14 }
  0x10   : > { %354 = vmatpush.msra.mxu2 %v339_v2  ;;  %v284_v8 = vld [vmem:[%s602_s4 + $0x60] sm:$0xff]  ;;  %324 = vmatpush.msra.mxu1 %v271_v9  ;;  %v283_v12 = vld [vmem:[%s602_s4 + $0x58] sm:$0xff]  ;;  %v269_v13 = vld [vmem:[%s601_s3 + $0x8] sm:$0xff]  ;;  %s265_s10 = scalar_lea.vmem %s604_s6, %s528_s14 }
  0x11   : > { %289 = vmatpush.msra.mxu0 %v286_v4  ;;  %v266_v10 = vld [vmem:[%s257_s17] sm:$0xff]  ;;  %v282_v14 = vld [vmem:[%s602_s4 + $0x50] sm:$0xff]  ;;  %v281_v16 = vld [vmem:[%s602_s4 + $0x48] sm:$0xff] }
  0x12   : > { %355 = vmatpush.msra.mxu2 %v338_v5  ;;  %325 = vmatpush.msra.mxu1 %v270_v11  ;;  %v268_v15 = vld [vmem:[%s601_s3] sm:$0xff]  ;;  %v279_v18 = vld [vmem:[%s602_s4 + $0x38] sm:$0xff]  ;;  %v278_v19 = vld [vmem:[%s602_s4 + $0x30] sm:$0xff] }
  0x13   : > { %290 = vmatpush.msra.mxu0 %v285_v6  ;;  %v280_v17 = vld [vmem:[%s602_s4 + $0x40] sm:$0xff]  ;;  %v277_v20 = vld [vmem:[%s602_s4 + $0x28] sm:$0xff]  ;;  %v275_v22 = vld [vmem:[%s602_s4 + $0x18] sm:$0xff] }
  0x14   : > { %356 = vmatpush.msra.mxu2 %v337_v7  ;;  %326 = vmatpush.msra.mxu1 %v269_v13  ;;  %v276_v21 = vld [vmem:[%s602_s4 + $0x20] sm:$0xff]  ;;  %v274_v23 = vld [vmem:[%s602_s4 + $0x10] sm:$0xff]  ;;  %v273_v24 = vld [vmem:[%s602_s4 + $0x8] sm:$0xff] }
  0x15   : > { %441 = vmatmul.msk.f32.vlgmr.msra.gmra.mxu2 %vm308_vm0, %v266_v10  ;;  %291 = vmatpush.msra.mxu0 %v284_v8  ;;  %v272_v25 = vld [vmem:[%s602_s4] sm:$0xff] }
  0x16   : > { %327 = vmatpush.msra.mxu1 %v268_v15  ;;  %v267_v26 = vld [vmem:[%s261_s29] sm:$0xff] }
  0x17   : > { %292 = vmatpush.msra.mxu0 %v283_v12  ;;  %440 = vmatmul.msk.f32.vlgmr.msra.gmra.mxu1 %vm308_vm0, %v266_v10  ;;  %v452_v32 = vld [vmem:[#allocation2] ss:$0 sm:$0xff] }
  0x19   : > { %293 = vmatpush.msra.mxu0 %v282_v14 }
  0x1b   : > { %294 = vmatpush.msra.mxu0 %v281_v16 }
  0x1d   : > { %295 = vmatpush.msra.mxu0 %v280_v17 }
  0x1f   : > { %296 = vmatpush.msra.mxu0 %v279_v18 }
  0x21   : > { %297 = vmatpush.msra.mxu0 %v278_v19 }
  0x23   : > { %298 = vmatpush.msra.mxu0 %v277_v20 }
  0x25   : > { %299 = vmatpush.msra.mxu0 %v276_v21 }
  0x27   : > { %300 = vmatpush.msra.mxu0 %v275_v22 }
  0x29   : > { %301 = vmatpush.msra.mxu0 %v274_v23 }
  0x2b   : > { %302 = vmatpush.msra.mxu0 %v273_v24 }
  0x2d   : > { %303 = vmatpush.msra.mxu0 %v272_v25 }
  0x2e   : > { %304 = vmatmul.f32.vlgmr.msra.gmra.mxu0 %v267_v26 }
  0x94   : > { %v329_v30 = vpop.f32.mrf.mxu1 }
  0x98   : > { %v358_v27 = vpop.f32.mrf.mxu2 }
  0x99   : > { %v361_v28 = vmul.f32 %v358_v27, %v267_v26 }
  0x9b   : > { %362 = vadd.xlane.f32.xlu0 %v361_v28 }
  0xab   : > { %v305_v29 = vpop.f32.mrf.mxu0 }
  0xac   : > { %v330_v31 = vadd.f32 %v329_v30, %v305_v29 }
  0xae   : > { %v336_v33 = vadd.f32 %v452_v32, %v330_v31 }
 0x10e   : > { %v363_v34 = vpop.xlane.xlu0 %362 }
 0x10f   : > { %v364_v35 = vadd.f32 %v363_v34, %v336_v33 }
 0x111   : > { %366 = vst.msk [vmem:[%s265_s10] sm:$0xff] %vm365_vm1, %v364_v35 }
 0x112 PF: > { %s18_s23 = sadd.s32 1, %s459_s23  }
 0x113   : > { %p15_p4 = scmp.ge.s32.totalorder %s18_s23, 4  }
 0x115   :  { %17 = sbr.rel (!%p15_p4) target bundleno = 3 (0x3), region = 77 }

// kernel: tpu_custom_call.1
= control target key start
LH: loop header
LB: loop body
LE: loop exit
PB: predicated region body
PF: predicated region fallthrough
CT: control target
= control target key end

     0   :  { %s499_s23 = smov 0   ;;  %s598_s0 = inlined_call_operand.vmem [shape: f32[16,32], index: 0, kind: input, shape index: {}]   ;;  %s599_s1 = inlined_call_operand.vmem [shape: f32[16,128], index: 1, kind: input, shape index: {}]   ;;  %s600_s2 = inlined_call_operand.vmem [shape: f32[1,32,128], index: 2, kind: input, shape index: {}]   ;;  %s601_s3 = inlined_call_operand.vmem [shape: f32[32,1], index: 3, kind: input, shape index: {}]   ;;  %s602_s4 = inlined_call_operand.vmem [shape: f32[128,1], index: 4, kind: input, shape index: {}]   ;;  %s603_s5 = inlined_call_operand.<no memory space> [shape: f32[1,1], index: 5, kind: input, shape index: {}]   ;;  %s604_s6 = inlined_call_operand.vmem [shape: f32[16,1], index: 6, kind: output, shape index: {}]  }
   0x1   :  { %v11_v0 = vstv %s603_s5 }
   0x2   :  { %12 = vst [vmem:[#allocation2] sm:$0x1] %v11_v0 }
   0x3 LB: > { %s432_s24 = sadd.s32 4294967295, %s459_s23   ;;  %p436_p0 = scmp.ge.s32.totalorder %s459_s23, 1  ;;  %s459_s23 = sphi %s499_s23, %s18_s23  }
   0x4   : > { %p222_p1 = scmp.lt.s32.totalorder %s459_s23, 3 }
   0x6   : > { %p223_p2 = pnand %p436_p0, %p222_p1 }
   0x7   : > { %p254_p3 = scmp.lt.s32.totalorder (!%p223_p2), %s432_s24, 1 }
   0x8   : > { %226 = sbr.rel (%p223_p2) target bundleno = 274 (0x112), region = 44 }
   0xd   : > { %v340_v1 = vld [vmem:[%s600_s2 + $0x18] sm:$0xff]  ;;  %v339_v2 = vld [vmem:[%s600_s2 + $0x10] sm:$0xff]  ;;  %v338_v5 = vld [vmem:[%s600_s2 + $0x8] sm:$0xff]  ;;  %s606_s24 = smov (!%p254_p3, %s432_s24), 1  ;;  %vm308_vm0 = vcmask 261120   ;;  %vm365_vm1 = vcmask 7168  }
   0xe   : > { %353 = vmatpush.msra.mxu2 %v340_v1  ;;  %v287_v3 = vld [vmem:[%s602_s4 + $0x78] sm:$0xff]  ;;  %v286_v4 = vld [vmem:[%s602_s4 + $0x70] sm:$0xff]  ;;  %v285_v6 = vld [vmem:[%s602_s4 + $0x68] sm:$0xff]  ;;  %s528_s14 = sshll.u32 %s606_s24, 3 }
   0xf   : > { %288 = vmatpush.msra.mxu0 %v287_v3  ;;  %v337_v7 = vld [vmem:[%s600_s2] sm:$0xff]  ;;  %s257_s17 = scalar_lea.vmem %s598_s0, %s528_s14  ;;  %v271_v9 = vld [vmem:[%s601_s3 + $0x18] sm:$0xff]  ;;  %v270_v11 = vld [vmem:[%s601_s3 + $0x10] sm:$0xff]  ;;  %s261_s29 = scalar_lea.vmem %s599_s1, %s528_s14 }
  0x10   : > { %354 = vmatpush.msra.mxu2 %v339_v2  ;;  %v284_v8 = vld [vmem:[%s602_s4 + $0x60] sm:$0xff]  ;;  %324 = vmatpush.msra.mxu1 %v271_v9  ;;  %v283_v12 = vld [vmem:[%s602_s4 + $0x58] sm:$0xff]  ;;  %v269_v13 = vld [vmem:[%s601_s3 + $0x8] sm:$0xff]  ;;  %s265_s10 = scalar_lea.vmem %s604_s6, %s528_s14 }
  0x11   : > { %289 = vmatpush.msra.mxu0 %v286_v4  ;;  %v266_v10 = vld [vmem:[%s257_s17] sm:$0xff]  ;;  %v282_v14 = vld [vmem:[%s602_s4 + $0x50] sm:$0xff]  ;;  %v281_v16 = vld [vmem:[%s602_s4 + $0x48] sm:$0xff] }
  0x12   : > { %355 = vmatpush.msra.mxu2 %v338_v5  ;;  %325 = vmatpush.msra.mxu1 %v270_v11  ;;  %v268_v15 = vld [vmem:[%s601_s3] sm:$0xff]  ;;  %v279_v18 = vld [vmem:[%s602_s4 + $0x38] sm:$0xff]  ;;  %v278_v19 = vld [vmem:[%s602_s4 + $0x30] sm:$0xff] }
  0x13   : > { %290 = vmatpush.msra.mxu0 %v285_v6  ;;  %v280_v17 = vld [vmem:[%s602_s4 + $0x40] sm:$0xff]  ;;  %v277_v20 = vld [vmem:[%s602_s4 + $0x28] sm:$0xff]  ;;  %v275_v22 = vld [vmem:[%s602_s4 + $0x18] sm:$0xff] }
  0x14   : > { %356 = vmatpush.msra.mxu2 %v337_v7  ;;  %326 = vmatpush.msra.mxu1 %v269_v13  ;;  %v276_v21 = vld [vmem:[%s602_s4 + $0x20] sm:$0xff]  ;;  %v274_v23 = vld [vmem:[%s602_s4 + $0x10] sm:$0xff]  ;;  %v273_v24 = vld [vmem:[%s602_s4 + $0x8] sm:$0xff] }
  0x15   : > { %441 = vmatmul.msk.f32.vlgmr.msra.gmra.mxu2 %vm308_vm0, %v266_v10  ;;  %291 = vmatpush.msra.mxu0 %v284_v8  ;;  %v272_v25 = vld [vmem:[%s602_s4] sm:$0xff] }
  0x16   : > { %327 = vmatpush.msra.mxu1 %v268_v15  ;;  %v267_v26 = vld [vmem:[%s261_s29] sm:$0xff] }
  0x17   : > { %292 = vmatpush.msra.mxu0 %v283_v12  ;;  %440 = vmatmul.msk.f32.vlgmr.msra.gmra.mxu1 %vm308_vm0, %v266_v10  ;;  %v452_v32 = vld [vmem:[#allocation2] ss:$0 sm:$0xff] }
  0x19   : > { %293 = vmatpush.msra.mxu0 %v282_v14 }
  0x1b   : > { %294 = vmatpush.msra.mxu0 %v281_v16 }
  0x1d   : > { %295 = vmatpush.msra.mxu0 %v280_v17 }
  0x1f   : > { %296 = vmatpush.msra.mxu0 %v279_v18 }
  0x21   : > { %297 = vmatpush.msra.mxu0 %v278_v19 }
  0x23   : > { %298 = vmatpush.msra.mxu0 %v277_v20 }
  0x25   : > { %299 = vmatpush.msra.mxu0 %v276_v21 }
  0x27   : > { %300 = vmatpush.msra.mxu0 %v275_v22 }
  0x29   : > { %301 = vmatpush.msra.mxu0 %v274_v23 }
  0x2b   : > { %302 = vmatpush.msra.mxu0 %v273_v24 }
  0x2d   : > { %303 = vmatpush.msra.mxu0 %v272_v25 }
  0x2e   : > { %304 = vmatmul.f32.vlgmr.msra.gmra.mxu0 %v267_v26 }
  0x94   : > { %v329_v30 = vpop.f32.mrf.mxu1 }
  0x98   : > { %v358_v27 = vpop.f32.mrf.mxu2 }
  0x99   : > { %v361_v28 = vmul.f32 %v358_v27, %v267_v26 }
  0x9b   : > { %362 = vadd.xlane.f32.xlu0 %v361_v28 }
  0xab   : > { %v305_v29 = vpop.f32.mrf.mxu0 }
  0xac   : > { %v330_v31 = vadd.f32 %v329_v30, %v305_v29 }
  0xae   : > { %v336_v33 = vadd.f32 %v452_v32, %v330_v31 }
 0x10e   : > { %v363_v34 = vpop.xlane.xlu0 %362 }
 0x10f   : > { %v364_v35 = vadd.f32 %v363_v34, %v336_v33 }
 0x111   : > { %366 = vst.msk [vmem:[%s265_s10] sm:$0xff] %vm365_vm1, %v364_v35 }
 0x112 PF: > { %s18_s23 = sadd.s32 1, %s459_s23  }
 0x113   : > { %p15_p4 = scmp.ge.s32.totalorder %s18_s23, 4  }
 0x115   :  { %17 = sbr.rel (!%p15_p4) target bundleno = 3 (0x3), region = 77 }

</bundles_post_ra>
